<compile_context>
chip_gen: v7x
topology: tpu7x:2x2x1
jax: 0.10.0
libtpu: 0.0.40
codegen_flags: <defaults>
</compile_context>

<pallas_src>
import functools
import math

import jax
import jax.numpy as jnp
from jax.experimental import pallas as pl
from jax.experimental.pallas import tpu as pltpu

LN_EPS = 1e-5
_INV_SQRT2 = 1.0 / math.sqrt(2.0)
_LANE = 128
_MXU_M = 256       # MXU M-height on v6e/v7x (two pushes on v5e's 128-row MXU)
_ROW_ALIGN = 16    # bf16 sublane packing: 16 rows per packed vreg


def _round_up(v: int, m: int) -> int:
    return ((v + m - 1) // m) * m


def _out_tiling(d_out: int):
    """Return (padded output width, output column-tile width)."""
    d_out_pad = _round_up(d_out, _LANE)
    if d_out_pad <= 2048:
        return d_out_pad, d_out_pad          # single lane-dense column tile
    tn = 512                                 # column-tile W2 / out for large d_out
    return _round_up(d_out_pad, tn), tn


def _vmem_capacity_bytes() -> int:
    try:
        cap = getattr(pltpu.get_tpu_info(), "vmem_capacity_bytes", None)
        if cap:
            return int(cap)
    except Exception:
        pass
    return 64 * 1024 * 1024   # conservative fallback (v7x per-core VMEM)


def _decoder_mlp_kernel(x_ref, w1_ref, b1_ref, g_ref, beta_ref, w2_ref, b2_ref,
                        o_ref, act_ref, *, gelu_approx):
    # Grid: (batch tiles i, output-column tiles j).  LN + GELU activations for the
    # current batch tile are computed once (j == 0) and cached in VMEM scratch.
    @pl.when(pl.program_id(1) == 0)
    def _():
        # Linear 1 on the MXU: in-kernel f32 -> bf16 cast (hides under the MXU),
        # f32 accumulation.
        x = x_ref[...].astype(w1_ref.dtype)
        h = jnp.dot(x, w1_ref[...], preferred_element_type=jnp.float32) + b1_ref[...]

        # LayerNorm over the hidden axis, fused single-pass statistics
        # (biased variance like nn.LayerNorm): var = E[h^2] - mu^2, f32 math.
        inv_h = 1.0 / h.shape[-1]
        mu = jnp.sum(h, axis=-1, keepdims=True) * inv_h
        ex2 = jnp.sum(h * h, axis=-1, keepdims=True) * inv_h
        var = jnp.maximum(ex2 - mu * mu, 0.0)
        rstd = jax.lax.rsqrt(var + LN_EPS)
        hn = (h - mu) * (rstd * g_ref[...]) + beta_ref[...]

        if gelu_approx:
            # tanh approximation runs on the EUP slot (~1e-3 off torch's default).
            act = jax.nn.gelu(hn, approximate=True)
        else:
            # Exact erf GELU: matches torch.nn.GELU() default.
            act = 0.5 * hn * (1.0 + jax.lax.erf(hn * _INV_SQRT2))
        # TODO(synk): training-mode dropout (p=0.1 mask + 1/(1-p) scaling) not
        # implemented; inference semantics (identity) are used.
        act_ref[...] = act.astype(act_ref.dtype)

    # Linear 2 on the MXU for the current output-column tile.
    out = jnp.dot(act_ref[...], w2_ref[...],
                  preferred_element_type=jnp.float32) + b2_ref[...]
    o_ref[...] = out.astype(o_ref.dtype)


def prepare_params(params, *, mxu_dtype=jnp.bfloat16):
    """One-time parameter prep (hoisted out of the per-call forward): cast matmul
    weights to the MXU dtype and lane-pad W2/b2 columns to the output tiling."""
    d_out = params["w2"].shape[1]
    d_out_pad, _ = _out_tiling(d_out)
    w2 = jnp.asarray(params["w2"], mxu_dtype)
    b2 = jnp.asarray(params["b2"], jnp.float32)
    if d_out_pad != d_out:
        w2 = jnp.pad(w2, ((0, 0), (0, d_out_pad - d_out)))
        b2 = jnp.pad(b2, ((0, 0), (0, d_out_pad - d_out)))
    return {
        "w1": jnp.asarray(params["w1"], mxu_dtype),
        "b1": jnp.asarray(params["b1"], jnp.float32),
        "ln_gamma": jnp.asarray(params["ln_gamma"], jnp.float32),
        "ln_beta": jnp.asarray(params["ln_beta"], jnp.float32),
        "w2": w2,
        "b2": b2,
    }


def wubu_decoder_forward(x, params, *, d_out=None, block_rows=None,
                         mxu_dtype=jnp.bfloat16, out_dtype=None,
                         gelu_approx=False):
    """x: [B, wubu_tangent_dim] -> [B, source_embedding_dim].

    `params` may be raw f32 (from init_params) or pre-cast/padded via
    prepare_params (preferred; avoids re-casting/padding weights every call).
    When params are pre-padded, pass the true output width via `d_out`.
    """
    w1 = params["w1"].astype(mxu_dtype)       # no-ops when params are prepared
    w2 = params["w2"].astype(mxu_dtype)
    b1 = params["b1"].astype(jnp.float32)
    g = params["ln_gamma"].astype(jnp.float32)
    beta = params["ln_beta"].astype(jnp.float32)
    b2 = params["b2"].astype(jnp.float32)

    B, d_in = x.shape
    hid = w1.shape[1]
    if d_out is None:
        d_out = w2.shape[1]
    d_out_pad, tn = _out_tiling(d_out)
    nj = d_out_pad // tn
    if w2.shape[1] != d_out_pad:               # only for raw (un-prepared) params
        w2 = jnp.pad(w2, ((0, 0), (0, d_out_pad - w2.shape[1])))
        b2 = jnp.pad(b2, ((0, 0), (0, d_out_pad - b2.shape[1])))

    out_dtype = x.dtype if out_dtype is None else out_dtype
    isz = jnp.dtype(mxu_dtype).itemsize
    osz = jnp.dtype(out_dtype).itemsize
    w2_bufs = 1 if nj == 1 else 2   # W2 tile only re-fetched when column-tiled

    # ---------- VMEM budgeting & batch-tile sizing ----------
    vmem_cap = _vmem_capacity_bytes()
    budget = int(0.8 * vmem_cap)    # headroom for compiler scratch / semaphores

    per_row = (2 * d_in * 4          # double-buffered f32 x tile
               + d_in * isz          # in-kernel bf16 copy of x
               + 2 * tn * osz        # double-buffered output tile
               + hid * isz           # cached-activation scratch
               + 6 * hid * 4)        # live f32 intermediates (h, hn, ...)
    fixed = (d_in * hid * isz + 3 * hid * 4
             + w2_bufs * (hid * tn * isz + tn * 4))
    # TODO(synk): if d_in*hid itself outgrows VMEM, add a K-tiled grid axis with an
    # accumulator scratch instead of a resident W1 (LayerNorm needs the full hid axis,
    # so hid cannot be K-tiled for Linear2 without extra care).
    rows_fit = max(_ROW_ALIGN, (budget - fixed - (4 << 20)) // per_row)

    if block_rows is None:
        if B <= min(rows_fit, 1024):
            block_rows = _round_up(B, _ROW_ALIGN)      # whole batch in one tile
        else:
            block_rows = max(_MXU_M, (min(1024, rows_fit) // _MXU_M) * _MXU_M)
    block_rows = max(_ROW_ALIGN, _round_up(int(block_rows), _ROW_ALIGN))

    b_pad = _round_up(B, block_rows)
    x_in = x if b_pad == B else jnp.pad(x, ((0, b_pad - B), (0, 0)))
    nb = b_pad // block_rows

    est = (2 * block_rows * d_in * 4 + block_rows * d_in * isz
           + 2 * block_rows * tn * osz + block_rows * hid * isz
           + 6 * block_rows * hid * 4 + fixed)
    vmem_limit = int(min(budget, max(2 * est, 32 * 1024 * 1024)))

    single = pl.Buffered(1)            # constant-index blocks: no double buffer
    w2_mode = pl.Buffered(w2_bufs)
    const = lambda i, j: (0, 0)

    kernel = functools.partial(_decoder_mlp_kernel, gelu_approx=gelu_approx)
    out = pl.pallas_call(
        kernel,
        out_shape=jax.ShapeDtypeStruct((b_pad, d_out_pad), out_dtype),
        grid_spec=pltpu.PrefetchScalarGridSpec(
            num_scalar_prefetch=0,
            grid=(nb, nj),
            in_specs=[
                pl.BlockSpec((block_rows, d_in), lambda i, j: (i, 0)),    # x (f32)
                pl.BlockSpec((d_in, hid), const, pipeline_mode=single),   # W1
                pl.BlockSpec((1, hid), const, pipeline_mode=single),      # b1
                pl.BlockSpec((1, hid), const, pipeline_mode=single),      # ln gamma
                pl.BlockSpec((1, hid), const, pipeline_mode=single),      # ln beta
                pl.BlockSpec((hid, tn), lambda i, j: (0, j),
                             pipeline_mode=w2_mode),                      # W2 tile
                pl.BlockSpec((1, tn), lambda i, j: (0, j),
                             pipeline_mode=w2_mode),                      # b2 tile
            ],
            out_specs=pl.BlockSpec((block_rows, tn), lambda i, j: (i, j)),
            scratch_shapes=[pltpu.VMEM((block_rows, hid), mxu_dtype)],    # cached acts
        ),
        compiler_params=pltpu.CompilerParams(
            dimension_semantics=("parallel", "arbitrary"),
            vmem_limit_bytes=vmem_limit),
    )(x_in, w1, b1, g, beta, w2, b2)

    return out[:B, :d_out]


def init_params(key, wubu_tangent_dim, source_embedding_dim, mlp_hidden_dim_ratio=2.0):
    """Deterministic init mirroring init_weights_general:
       xavier_uniform(gain=sqrt(2)) for Linear weights, zeros for biases,
       ones/zeros for LayerNorm affine params. Weights stored as [in, out]."""
    hid = int(wubu_tangent_dim * mlp_hidden_dim_ratio)
    k1, k2 = jax.random.split(key)
    gain = math.sqrt(2.0)  # nn.init.calculate_gain('relu')

    def xavier_uniform(k, fan_in, fan_out):
        bound = gain * math.sqrt(6.0 / (fan_in + fan_out))
        return jax.random.uniform(k, (fan_in, fan_out), jnp.float32, -bound, bound)

    return {
        "w1": xavier_uniform(k1, wubu_tangent_dim, hid),
        "b1": jnp.zeros((1, hid), jnp.float32),
        "ln_gamma": jnp.ones((1, hid), jnp.float32),
        "ln_beta": jnp.zeros((1, hid), jnp.float32),
        "w2": xavier_uniform(k2, hid, source_embedding_dim),
        "b2": jnp.zeros((1, source_embedding_dim), jnp.float32),
    }


def _reference_forward(x, p, mxu_dtype=jnp.bfloat16):
    """Pure-JAX reference with the same bf16-matmul / f32-accumulate recipe
    (two-pass LayerNorm variance, exact erf GELU)."""
    w1 = p["w1"].astype(mxu_dtype)
    w2 = p["w2"].astype(mxu_dtype)
    h = jnp.dot(x.astype(mxu_dtype), w1, preferred_element_type=jnp.float32) + p["b1"]
    inv_h = 1.0 / h.shape[-1]
    mu = jnp.sum(h, axis=-1, keepdims=True) * inv_h
    hm = h - mu
    var = jnp.sum(hm * hm, axis=-1, keepdims=True) * inv_h
    hn = hm * (jax.lax.rsqrt(var + LN_EPS) * p["ln_gamma"]) + p["ln_beta"]
    act = 0.5 * hn * (1.0 + jax.lax.erf(hn * _INV_SQRT2))
    return jnp.dot(act.astype(mxu_dtype), w2, preferred_element_type=jnp.float32) + p["b2"]


if __name__ == "__main__":
    wubu_tangent_dim = 32
    source_embedding_dim = 48
    batch = 16

    key = jax.random.PRNGKey(0)
    kx, kp = jax.random.split(key)
    x = jax.random.normal(kx, (batch, wubu_tangent_dim), jnp.float32)
    raw_params = init_params(kp, wubu_tangent_dim, source_embedding_dim)

    # One-time param prep (bf16 cast + lane-padding) hoisted out of the forward.
    params = prepare_params(raw_params)

    fwd = jax.jit(functools.partial(wubu_decoder_forward, d_out=source_embedding_dim))
    out = jax.block_until_ready(fwd(x, params))

    ref = _reference_forward(x, raw_params)
    assert out.shape == (batch, source_embedding_dim)
    assert jnp.allclose(out, ref, atol=2e-3, rtol=2e-3), (
        f"mismatch vs reference: max abs diff = {jnp.max(jnp.abs(out - ref))}")

    print("KERNEL_OK")
</pallas_src>

<mosaic_0001>
module attributes {stable_mosaic.version = 11 : i64} {
  func.func @_decoder_mlp_kernel(%arg0: i32, %arg1: i32, %arg2: memref<16x32xf32, #tpu.memory_space<vmem>>, %arg3: memref<32x64xbf16, #tpu.memory_space<vmem>>, %arg4: memref<1x64xf32, #tpu.memory_space<vmem>>, %arg5: memref<1x64xf32, #tpu.memory_space<vmem>>, %arg6: memref<1x64xf32, #tpu.memory_space<vmem>>, %arg7: memref<64x128xbf16, #tpu.memory_space<vmem>>, %arg8: memref<1x128xf32, #tpu.memory_space<vmem>>, %arg9: memref<16x128xf32, #tpu.memory_space<vmem>>, %arg10: memref<16x64xbf16, #tpu.memory_space<vmem>>) attributes {dimension_semantics = [#tpu.dimension_semantics<parallel>, #tpu.dimension_semantics<arbitrary>], iteration_bounds = array<i64: 1, 1>, scalar_prefetch = 0 : i64, scratch_operands = 1 : i64, tpu.core_type = #tpu.core_type<tc>, window_params = [{transform_indices = @transform_0, window_bounds = array<i64: 16, 32>}, {pipeline_mode = #tpu.pipeline_mode<synchronous>, transform_indices = @transform_1, window_bounds = array<i64: 32, 64>}, {pipeline_mode = #tpu.pipeline_mode<synchronous>, transform_indices = @transform_2, window_bounds = array<i64: 1, 64>}, {pipeline_mode = #tpu.pipeline_mode<synchronous>, transform_indices = @transform_3, window_bounds = array<i64: 1, 64>}, {pipeline_mode = #tpu.pipeline_mode<synchronous>, transform_indices = @transform_4, window_bounds = array<i64: 1, 64>}, {pipeline_mode = #tpu.pipeline_mode<synchronous>, transform_indices = @transform_5, window_bounds = array<i64: 64, 128>}, {pipeline_mode = #tpu.pipeline_mode<synchronous>, transform_indices = @transform_6, window_bounds = array<i64: 1, 128>}, {transform_indices = @transform_7, window_bounds = array<i64: 16, 128>}]} {
    %c0_i32 = arith.constant 0 : i32
    %0 = arith.cmpi eq, %arg1, %c0_i32 : i32
    %1 = arith.extui %0 : i1 to i32
    %c0_i32_0 = arith.constant 0 : i32
    %2 = arith.cmpi ne, %1, %c0_i32_0 : i32
    scf.if %2 {
      %c0_8 = arith.constant 0 : index
      %c0_9 = arith.constant 0 : index
      %10 = vector.load %arg2[%c0_8, %c0_9] : memref<16x32xf32, #tpu.memory_space<vmem>>, vector<16x32xf32>
      %11 = arith.truncf %10 : vector<16x32xf32> to vector<16x32xbf16>
      %c0_10 = arith.constant 0 : index
      %c0_11 = arith.constant 0 : index
      %12 = vector.load %arg3[%c0_10, %c0_11] : memref<32x64xbf16, #tpu.memory_space<vmem>>, vector<32x64xbf16>
      %cst_12 = arith.constant dense<0.000000e+00> : vector<16x64xf32>
      %13 = tpu.matmul %11, %12, %cst_12 {dimension_numbers = #tpu.dot_dimension_numbers<[1], [0], [0], [1], [0, 0, 1, 1], [], []>} : vector<16x32xbf16>, vector<32x64xbf16>, vector<16x64xf32> -> vector<16x64xf32>
      %c0_13 = arith.constant 0 : index
      %c0_14 = arith.constant 0 : index
      %14 = vector.load %arg4[%c0_13, %c0_14] : memref<1x64xf32, #tpu.memory_space<vmem>>, vector<1x64xf32>
      %15 = vector.broadcast %14 : vector<1x64xf32> to vector<16x64xf32>
      %16 = arith.addf %13, %15 : vector<16x64xf32>
      %cst_15 = arith.constant dense<0.000000e+00> : vector<16xf32>
      %17 = vector.multi_reduction <add>, %16, %cst_15 [1] : vector<16x64xf32> to vector<16xf32>
      %18 = vector.shape_cast %17 : vector<16xf32> to vector<16x1xf32>
      %cst_16 = arith.constant 1.562500e-02 : f32
      %19 = vector.broadcast %cst_16 : f32 to vector<16x1xf32>
      %20 = arith.mulf %18, %19 : vector<16x1xf32>
      %21 = arith.mulf %16, %16 : vector<16x64xf32>
      %cst_17 = arith.constant dense<0.000000e+00> : vector<16xf32>
      %22 = vector.multi_reduction <add>, %21, %cst_17 [1] : vector<16x64xf32> to vector<16xf32>
      %23 = vector.shape_cast %22 : vector<16xf32> to vector<16x1xf32>
      %cst_18 = arith.constant 1.562500e-02 : f32
      %24 = vector.broadcast %cst_18 : f32 to vector<16x1xf32>
      %25 = arith.mulf %23, %24 : vector<16x1xf32>
      %26 = arith.mulf %20, %20 : vector<16x1xf32>
      %27 = arith.subf %25, %26 : vector<16x1xf32>
      %cst_19 = arith.constant 0.000000e+00 : f32
      %28 = vector.broadcast %cst_19 : f32 to vector<16x1xf32>
      %29 = arith.maximumf %27, %28 : vector<16x1xf32>
      %cst_20 = arith.constant 9.99999974E-6 : f32
      %30 = vector.broadcast %cst_20 : f32 to vector<16x1xf32>
      %31 = arith.addf %29, %30 : vector<16x1xf32>
      %32 = math.rsqrt %31 : vector<16x1xf32>
      %33 = vector.broadcast %20 : vector<16x1xf32> to vector<16x64xf32>
      %34 = arith.subf %16, %33 : vector<16x64xf32>
      %c0_21 = arith.constant 0 : index
      %c0_22 = arith.constant 0 : index
      %35 = vector.load %arg5[%c0_21, %c0_22] : memref<1x64xf32, #tpu.memory_space<vmem>>, vector<1x64xf32>
      %36 = vector.broadcast %32 : vector<16x1xf32> to vector<16x64xf32>
      %37 = vector.broadcast %35 : vector<1x64xf32> to vector<16x64xf32>
      %38 = arith.mulf %36, %37 : vector<16x64xf32>
      %39 = arith.mulf %34, %38 : vector<16x64xf32>
      %c0_23 = arith.constant 0 : index
      %c0_24 = arith.constant 0 : index
      %40 = vector.load %arg6[%c0_23, %c0_24] : memref<1x64xf32, #tpu.memory_space<vmem>>, vector<1x64xf32>
      %41 = vector.broadcast %40 : vector<1x64xf32> to vector<16x64xf32>
      %42 = arith.addf %39, %41 : vector<16x64xf32>
      %cst_25 = arith.constant 5.000000e-01 : f32
      %43 = vector.broadcast %cst_25 : f32 to vector<16x64xf32>
      %44 = arith.mulf %43, %42 : vector<16x64xf32>
      %cst_26 = arith.constant 0.707106769 : f32
      %45 = vector.broadcast %cst_26 : f32 to vector<16x64xf32>
      %46 = arith.mulf %42, %45 : vector<16x64xf32>
      %47 = math.erf %46 : vector<16x64xf32>
      %cst_27 = arith.constant 1.000000e+00 : f32
      %48 = vector.broadcast %cst_27 : f32 to vector<16x64xf32>
      %49 = arith.addf %48, %47 : vector<16x64xf32>
      %50 = arith.mulf %44, %49 : vector<16x64xf32>
      %51 = arith.truncf %50 : vector<16x64xf32> to vector<16x64xbf16>
      %c0_28 = arith.constant 0 : index
      %c0_29 = arith.constant 0 : index
      %52 = vector.load %arg10[%c0_28, %c0_29] : memref<16x64xbf16, #tpu.memory_space<vmem>>, vector<16x64xbf16>
      tpu.vector_store %arg10[%c0_28, %c0_29], %51 {strides = array<i32>} : memref<16x64xbf16, #tpu.memory_space<vmem>>, vector<16x64xbf16>,
    } else {
    }
    %c0 = arith.constant 0 : index
    %c0_1 = arith.constant 0 : index
    %3 = vector.load %arg10[%c0, %c0_1] : memref<16x64xbf16, #tpu.memory_space<vmem>>, vector<16x64xbf16>
    %c0_2 = arith.constant 0 : index
    %c0_3 = arith.constant 0 : index
    %4 = vector.load %arg7[%c0_2, %c0_3] : memref<64x128xbf16, #tpu.memory_space<vmem>>, vector<64x128xbf16>
    %cst = arith.constant dense<0.000000e+00> : vector<16x128xf32>
    %5 = tpu.matmul %3, %4, %cst {dimension_numbers = #tpu.dot_dimension_numbers<[1], [0], [0], [1], [0, 0, 1, 1], [], []>} : vector<16x64xbf16>, vector<64x128xbf16>, vector<16x128xf32> -> vector<16x128xf32>
    %c0_4 = arith.constant 0 : index
    %c0_5 = arith.constant 0 : index
    %6 = vector.load %arg8[%c0_4, %c0_5] : memref<1x128xf32, #tpu.memory_space<vmem>>, vector<1x128xf32>
    %7 = vector.broadcast %6 : vector<1x128xf32> to vector<16x128xf32>
    %8 = arith.addf %5, %7 : vector<16x128xf32>
    %c0_6 = arith.constant 0 : index
    %c0_7 = arith.constant 0 : index
    %9 = vector.load %arg9[%c0_6, %c0_7] : memref<16x128xf32, #tpu.memory_space<vmem>>, vector<16x128xf32>
    tpu.vector_store %arg9[%c0_6, %c0_7], %8 {strides = array<i32>} : memref<16x128xf32, #tpu.memory_space<vmem>>, vector<16x128xf32>,
    return
  }
  func.func @transform_0(%arg0: i32, %arg1: i32) -> (i32, i32) {
    %c0_i32 = arith.constant 0 : i32
    %c0_i32_0 = arith.constant 0 : i32
    return %arg0, %c0_i32 : i32, i32
  }
  func.func @transform_1(%arg0: i32, %arg1: i32) -> (i32, i32) {
    %c0_i32 = arith.constant 0 : i32
    %c0_i32_0 = arith.constant 0 : i32
    %c0_i32_1 = arith.constant 0 : i32
    return %c0_i32, %c0_i32_0 : i32, i32
  }
  func.func @transform_2(%arg0: i32, %arg1: i32) -> (i32, i32) {
    %c0_i32 = arith.constant 0 : i32
    %c0_i32_0 = arith.constant 0 : i32
    %c0_i32_1 = arith.constant 0 : i32
    return %c0_i32, %c0_i32_0 : i32, i32
  }
  func.func @transform_3(%arg0: i32, %arg1: i32) -> (i32, i32) {
    %c0_i32 = arith.constant 0 : i32
    %c0_i32_0 = arith.constant 0 : i32
    %c0_i32_1 = arith.constant 0 : i32
    return %c0_i32, %c0_i32_0 : i32, i32
  }
  func.func @transform_4(%arg0: i32, %arg1: i32) -> (i32, i32) {
    %c0_i32 = arith.constant 0 : i32
    %c0_i32_0 = arith.constant 0 : i32
    %c0_i32_1 = arith.constant 0 : i32
    return %c0_i32, %c0_i32_0 : i32, i32
  }
  func.func @transform_5(%arg0: i32, %arg1: i32) -> (i32, i32) {
    %c0_i32 = arith.constant 0 : i32
    %c0_i32_0 = arith.constant 0 : i32
    return %c0_i32, %arg1 : i32, i32
  }
  func.func @transform_6(%arg0: i32, %arg1: i32) -> (i32, i32) {
    %c0_i32 = arith.constant 0 : i32
    %c0_i32_0 = arith.constant 0 : i32
    return %c0_i32, %arg1 : i32, i32
  }
  func.func @transform_7(%arg0: i32, %arg1: i32) -> (i32, i32) {
    %c0_i32 = arith.constant 0 : i32
    return %arg0, %arg1 : i32, i32
  }
}

</mosaic_0001>

<bundles_post_ra>
// kernel: wubu_decoder_forward.1
= control target key start
LH: loop header
LB: loop body
LE: loop exit
PB: predicated region body
PF: predicated region fallthrough
CT: control target
= control target key end

     0   :  { %12 = vsyncpa [#allocation4], 0  ;;  %s648_s0 = inlined_call_operand.hbm [shape: f32[16,32], index: 0, kind: input, shape index: {}]   ;;  %s649_s1 = inlined_call_operand.vmem [shape: bf16[32,64], index: 1, kind: input, shape index: {}]   ;;  %s650_s2 = inlined_call_operand.vmem [shape: f32[1,64], index: 2, kind: input, shape index: {}]   ;;  %s651_s3 = inlined_call_operand.vmem [shape: f32[1,64], index: 3, kind: input, shape index: {}]   ;;  %s652_s4 = inlined_call_operand.hbm [shape: f32[1,64], index: 4, kind: input, shape index: {}]   ;;  %s653_s5 = inlined_call_operand.hbm [shape: bf16[64,128], index: 5, kind: input, shape index: {}]   ;;  %s654_s6 = inlined_call_operand.hbm [shape: f32[1,128], index: 6, kind: input, shape index: {}]   ;;  %s655_s7 = inlined_call_operand.hbm [shape: f32[16,128], index: 7, kind: output, shape index: {}]  }
   0x1   :  { %13 = vsyncpa [#allocation7], 0 }
   0x2   :  { %14 = vsyncpa [#allocation10], 0 }
   0x3   :  { %15 = vsyncpa [#allocation5], 0  ;;  %s506_s24 = smov [#allocation6]   ;;  %s507_s26 = smov [#allocation3]  }
   0x4   :  { %s40_s25 = sshll.u32 %s506_s24, 4  ;;  %s21_s27 = sshll.u32 %s507_s26, 4  ;;  %s41_s25 = int_to_ptr.vmem [resolvable:$true] %s40_s25  ;;  %s557_s27 = int_to_ptr.vmem [resolvable:$true] %s21_s27 }
   0x5   :  { %s388_s30 = scalar_lea.hbm %s652_s4, 16 }
   0x6   :  { %p389_p0 = scmp.ne.s32.totalorder %s652_s4, %s388_s30  ;;  %p392_p1 = scmp.lt.u32.totalorder %s388_s30, %s652_s4 }
   0x8   :  { %p394_p2 = pnand %p392_p1, %p389_p0 }
   0xa   :  { %397 = shalt.err (!%p394_p2)
}
   0xb   :  { %s398_s12 = scalar_lea.vmem %s41_s25, 16  ;;  %s402_s13 = scalar_lea.vmem %s41_s25, 32 }
   0xc   :  { %p399_p3 = scmp.ne.s32.totalorder %s41_s25, %s398_s12  ;;  %p403_p4 = scmp.lt.s32.totalorder %s41_s25, %s41_s25 }
   0xd   :  { %p404_p5 = scmp.lt.s32.totalorder %s402_s13, %s398_s12 }
   0xf   :  { %p405_p6 = por %p404_p5, %p403_p4 }
  0x11   :  { %p406_p7 = pnand %p405_p6, %p399_p3 }
  0x13   :  { %409 = shalt.err (!%p406_p7)
}
  0x14   :  { %43 = dma.hbm_to_vmem [thread:$0]  %s652_s4, 16, %s41_s25, [#allocation7]  }
  0x15   :  { %s410_s18 = scalar_lea.hbm %s648_s0, 256 }
  0x16   :  { %p411_p8 = scmp.ne.s32.totalorder %s648_s0, %s410_s18  ;;  %p414_p9 = scmp.lt.u32.totalorder %s410_s18, %s648_s0 }
  0x18   :  { %p416_p10 = pnand %p414_p9, %p411_p8 }
  0x1a   :  { %419 = shalt.err (!%p416_p10)
}
  0x1b   :  { %s420_s23 = scalar_lea.vmem %s557_s27, 256  ;;  %p425_p12 = scmp.lt.s32.totalorder %s557_s27, %s557_s27 }
  0x1c   :  { %p421_p11 = scmp.ne.s32.totalorder %s557_s27, %s420_s23  ;;  %p426_p13 = scmp.lt.s32.totalorder %s420_s23, %s420_s23 }
  0x1e   :  { %p427_p0 = por %p426_p13, %p425_p12 }
  0x20   :  { %p428_p1 = pnand %p427_p0, %p421_p11 }
  0x22   :  { %431 = shalt.err (!%p428_p1)
}
  0x23   :  { %s508_s4 = smov 128   ;;  %s509_s24 = smov 8  }
  0x24   :  { %27 = dma.hbm_to_vmem [thread:$0]  %s648_s0, 256, %s557_s27, [#allocation4], %s508_s4, %s508_s4, %s509_s24  }
  0x25   :  { %s510_s28 = smov [#allocation8]   ;;  %s432_s9 = scalar_lea.hbm %s653_s5, 512 }
  0x26   :  { %s49_s29 = sshll.u32 %s510_s28, 4  ;;  %p433_p2 = scmp.ne.s32.totalorder %s653_s5, %s432_s9  ;;  %s50_s29 = int_to_ptr.vmem [resolvable:$true] %s49_s29 }
  0x27   :  { %p436_p3 = scmp.lt.u32.totalorder %s432_s9, %s653_s5 }
  0x29   :  { %p438_p4 = pnand %p436_p3, %p433_p2 }
  0x2b   :  { %441 = shalt.err (!%p438_p4)
}
  0x2c   :  { %s442_s14 = scalar_lea.vmem %s50_s29, 512  ;;  %p447_p6 = scmp.lt.s32.totalorder %s50_s29, %s50_s29 }
  0x2d   :  { %p443_p5 = scmp.ne.s32.totalorder %s50_s29, %s442_s14  ;;  %p448_p7 = scmp.lt.s32.totalorder %s442_s14, %s442_s14 }
  0x2f   :  { %p449_p8 = por %p448_p7, %p447_p6 }
  0x31   :  { %p450_p9 = pnand %p449_p8, %p443_p5 }
  0x33   :  { %453 = shalt.err (!%p450_p9)
}
  0x34   :  { %s511_s0 = smov 64   ;;  %s512_s27 = smov 4  }
  0x35   :  { %55 = dma.hbm_to_vmem [thread:$0]  %s653_s5, 512, %s50_s29, [#allocation7], %s511_s0, %s511_s0, %s512_s27  }
  0x36   :  { %s513_s17 = smov [#allocation9]   ;;  %s454_s21 = scalar_lea.hbm %s654_s6, 16 }
  0x37   :  { %s62_s18 = sshll.u32 %s513_s17, 4  ;;  %p455_p10 = scmp.ne.s32.totalorder %s654_s6, %s454_s21  ;;  %s63_s18 = int_to_ptr.vmem [resolvable:$true] %s62_s18 }
  0x38   :  { %p458_p11 = scmp.lt.u32.totalorder %s454_s21, %s654_s6 }
  0x3a   :  { %p460_p12 = pnand %p458_p11, %p455_p10 }
  0x3c   :  { %463 = shalt.err (!%p460_p12)
}
  0x3d   :  { %s464_s28 = scalar_lea.vmem %s63_s18, 16  ;;  %s468_s5 = scalar_lea.vmem %s63_s18, 32 }
  0x3e   :  { %p465_p13 = scmp.ne.s32.totalorder %s63_s18, %s464_s28  ;;  %p469_p0 = scmp.lt.s32.totalorder %s63_s18, %s63_s18 }
  0x3f   :  { %p470_p1 = scmp.lt.s32.totalorder %s468_s5, %s464_s28 }
  0x41   :  { %p471_p2 = por %p470_p1, %p469_p0 }
  0x43   :  { %p472_p3 = pnand %p471_p2, %p465_p13 }
  0x45   :  { %475 = shalt.err (!%p472_p3)
}
  0x46   :  { %65 = dma.hbm_to_vmem [thread:$0]  %s654_s6, 16, %s63_s18, [#allocation10]  }
  0x47   :  { %498 = dma.done.wait [#allocation4], 256  }
  0x48   :  { %499 = vsyncadd [#allocation4], 4294967040 }
  0x49   :  { %500 = dma.done.wait [#allocation7], 528  }
  0x4a   :  { %501 = vsyncadd [#allocation7], 4294966768 }
  0x4b   :  { %502 = dma.done.wait [#allocation10], 16  }
  0x4c   :  { %503 = vsyncadd [#allocation10], 4294967280  ;;  %v514_v0 = vmov 0.0   ;;  %vm515_vm0 = vmmov 0   ;;  %v374_v1 = vld [vmem:[%s649_s1] sm:$0xff]   ;;  %v375_v2 = vld [vmem:[%s649_s1 + $0x8] sm:$0xff]  }
  0x4d   :  { %343 = vmatprep.subr.bf16.mxu0 %v514_v0  ;;  %347 = vmatprep.mubr.msk.bf16.mxu0 %vm515_vm0, %v514_v0  ;;  %v83_v3 = vld [vmem:[#allocation3] sm:$0xff]  ;;  %v84_v4 = vld [vmem:[#allocation3 + $0x8] sm:$0xff]  ;;  %vm109_vm1 = vcmask 261120   ;;  %v323_v6 = vld [vmem:[%s650_s2] ss:$0 sm:$0xff]  ;;  %vm154_vm2 = vcmask 523264  }
  0x4e   :  { %351 = vmatprep.subr.bf16.mxu1 %v514_v0  ;;  %359 = vmatprep.mubr.msk.bf16.mxu1 %vm515_vm0, %v514_v0  ;;  %v85_v5 = vpack.c.bf16 %v84_v4, %v83_v3  ;;  %v376_v19 = vld [vmem:[#allocation8] sm:$0xff]   ;;  %v377_v20 = vld [vmem:[#allocation8 + $0x8] sm:$0xff]   ;;  %v378_v21 = vld [vmem:[#allocation8 + $0x10] sm:$0xff]  }
  0x4f   :  { %344 = vmatpush3.bf16.msra.mxu0 %v374_v1  ;;  %352 = vmatpush3.bf16.msra.mxu1 %v376_v19  ;;  %v379_v22 = vld [vmem:[#allocation8 + $0x18] sm:$0xff]   ;;  %v327_v39 = vld [vmem:[%s651_s3] ss:$0 sm:$0xff]  ;;  %v329_v63 = vld [vmem:[#allocation9] ss:$0 sm:$0xff]  ;;  %s516_s3 = smov [#allocation11]  }
  0x50   :  { %345 = vmatprep.subr.bf16.mxu0 %v514_v0  ;;  %353 = vmatprep.subr.bf16.mxu1 %v514_v0  ;;  %v328_v43 = vld [vmem:[#allocation6] ss:$0 sm:$0xff]  ;;  %s309_s13 = sshll.u32 %s516_s3, 4  ;;  %s310_s13 = int_to_ptr.vmem [resolvable:$true] %s309_s13 }
  0x51   :  { %s476_s14 = scalar_lea.vmem %s310_s13, 256  ;;  %p481_p5 = scmp.lt.s32.totalorder %s310_s13, %s310_s13 }
  0x52   :  { %p477_p4 = scmp.ne.s32.totalorder %s310_s13, %s476_s14  ;;  %p482_p6 = scmp.lt.s32.totalorder %s476_s14, %s476_s14 }
  0x53   :  { %346 = vmatpush3.bf16.msra.mxu0 %v375_v2  ;;  %354 = vmatpush3.bf16.msra.mxu1 %v377_v20 }
  0x54   :  { %355 = vmatprep.subr.bf16.mxu1 %v514_v0  ;;  %p483_p7 = por %p482_p6, %p481_p5 }
  0x56   :  { %348 = vmatmul.mubr.msk.bf16.vlgmr.msra.gmra.mrb[0].mxu0 %vm109_vm1, %v85_v5  ;;  %p484_p8 = pnand %p483_p7, %p477_p4 }
  0x57   :  { %356 = vmatpush3.bf16.msra.mxu1 %v378_v21 }
  0x58   :  { %357 = vmatprep.subr.bf16.mxu1 %v514_v0 }
  0x5b   :  { %358 = vmatpush3.bf16.msra.mxu1 %v379_v22 }
 0x129   :  { %v147_v7 = vpop.f32.mrb[0].mxu0 }
 0x12a   :  { %v148_v8 = vadd.f32 %v323_v6, %v147_v7  ;;  %v349_v9 = vpop.f32.mrb[1].mxu0 }
 0x12b   :  { %v150_v10 = vpop.f32.mrb[2].mxu0 }
 0x12c   :  { %v151_v11 = vadd.f32 %v323_v6, %v150_v10  ;;  %v350_v12 = vpop.f32.mrb[3].mxu0  ;;  %v155_v13 = vsel %vm154_vm2, %v148_v8, 0.0  ;;  %v163_v14 = vmul.f32 %v148_v8, %v148_v8 }
 0x12d   :  { %156 = vadd.xlane.f32.xlu0 %v155_v13 }
 0x12e   :  { %v165_v15 = vsel %vm154_vm2, %v163_v14, 0.0  ;;  %v164_v16 = vmul.f32 %v151_v11, %v151_v11  ;;  %v158_v17 = vsel %vm154_vm2, %v151_v11, 0.0 }
 0x12f   :  { %166 = vadd.xlane.f32.xlu1 %v165_v15 }
 0x130   :  { %v168_v18 = vsel %vm154_vm2, %v164_v16, 0.0 }
 0x131   :  { %159 = vadd.xlane.f32.xlu0 %v158_v17 }
 0x133   :  { %169 = vadd.xlane.f32.xlu1 %v168_v18 }
 0x1ba   :  { %v157_v23 = vpop.xlane.xlu0 %156 }
 0x1bb   :  { %v161_v24 = vmul.f32 0.015625, %v157_v23 }
 0x1bc   :  { %v167_v25 = vpop.xlane.xlu1 %166 }
 0x1bd   :  { %v173_v26 = vmul.f32 %v161_v24, %v161_v24  ;;  %v171_v27 = vmul.f32 0.015625, %v167_v25  ;;  %v183_v41 = vsub.f32 %v148_v8, %v161_v24 }
 0x1be   :  { %v160_v28 = vpop.xlane.xlu0 %159 }
 0x1bf   :  { %v175_v29 = vsub.f32 %v171_v27, %v173_v26  ;;  %v162_v30 = vmul.f32 0.015625, %v160_v28 }
 0x1c0   :  { %v170_v31 = vpop.xlane.xlu1 %169 }
 0x1c1   :  { %v177_v32 = vmax.f32 %v175_v29, 0.0  ;;  %v174_v33 = vmul.f32 %v162_v30, %v162_v30  ;;  %v172_v34 = vmul.f32 0.015625, %v170_v31  ;;  %v184_v47 = vsub.f32 %v151_v11, %v162_v30 }
 0x1c3   :  { %v179_v35 = vadd.f32 1e-05, %v177_v32  ;;  %v176_v36 = vsub.f32 %v172_v34, %v174_v33 }
 0x1c5   :  { %380 = vrsqrt.f32 %v179_v35  ;;  %v178_v37 = vmax.f32 %v176_v36, 0.0 }
 0x1c7   :  { %v180_v38 = vadd.f32 1e-05, %v178_v37 }
 0x1c9   :  { %382 = vrsqrt.f32 %v180_v38 }
 0x1cf   :  { %v381_v40 = vpop.eup %380 }
 0x1d0   :  { %v192_v42 = vmul.f32 %v381_v40, %v327_v39 }
 0x1d2   :  { %v194_v44 = vmul.f32 %v192_v42, %v183_v41 }
 0x1d3   :  { %v383_v45 = vpop.eup %382 }
 0x1d4   :  { %v203_v46 = vadd.f32 %v328_v43, %v194_v44  ;;  %v193_v48 = vmul.f32 %v383_v45, %v327_v39 }
 0x1d6   :  { %v207_v49 = vmul.f32 0.70710677, %v203_v46  ;;  %v195_v50 = vmul.f32 %v193_v48, %v184_v47  ;;  %v205_v56 = vmul.f32 0.5, %v203_v46 }
 0x1d8   :  { %384 = verf.f32 %v207_v49  ;;  %v204_v51 = vadd.f32 %v328_v43, %v195_v50 }
 0x1da   :  { %v208_v52 = vmul.f32 0.70710677, %v204_v51  ;;  %v206_v57 = vmul.f32 0.5, %v204_v51 }
 0x1dc   :  { %386 = verf.f32 %v208_v52 }
 0x1e2   :  { %v385_v53 = vpop.eup %384 }
 0x1e3   :  { %v211_v54 = vadd.f32 1.0, %v385_v53 }
 0x1e5   :  { %v213_v59 = vmul.f32 %v211_v54, %v205_v56 }
 0x1e6   :  { %v387_v55 = vpop.eup %386 }
 0x1e7   :  { %v212_v58 = vadd.f32 1.0, %v387_v55 }
 0x1e9   :  { %v214_v60 = vmul.f32 %v212_v58, %v206_v57 }
 0x1eb   :  { %v215_v61 = vpack.c.bf16 %v214_v60, %v213_v59 }
 0x1ed   :  { %216 = vst.msk [vmem:[#allocation2] sm:$0xff] %vm154_vm2, %v215_v61 }
 0x1f4   :  { %v217_v62 = vld [vmem:[#allocation2] sm:$0xff] }
 0x1f5   :  { %360 = vmatmul.mubr.msk.bf16.vlgmr.msra.gmra.mrb[0].mxu1 %vm154_vm2, %v217_v62 }
 0x2c8   :  { %v295_v0 = vpop.f32.mrb[0].mxu1 }
 0x2c9   :  { %v296_v1 = vadd.f32 %v329_v63, %v295_v0  ;;  %v361_v2 = vpop.f32.mrb[1].mxu1 }
 0x2ca   :  { %v298_v3 = vpop.f32.mrb[2].mxu1 }
 0x2cb   :  { %302 = vst [vmem:[#allocation11] sm:$0xff] %v296_v1  ;;  %v299_v4 = vadd.f32 %v329_v63, %v298_v3  ;;  %v362_v5 = vpop.f32.mrb[3].mxu1 }
 0x2cd   :  { %303 = vst [vmem:[#allocation11 + $0x8] sm:$0xff] %v299_v4 }
 0x2ce   :  { %487 = shalt.err (!%p484_p8)
}
 0x2cf   :  { %s488_s15 = scalar_lea.hbm %s655_s7, 256 }
 0x2d0   :  { %p489_p9 = scmp.ne.s32.totalorder %s655_s7, %s488_s15  ;;  %p492_p10 = scmp.lt.u32.totalorder %s488_s15, %s655_s7 }
 0x2d2   :  { %p494_p11 = pnand %p492_p10, %p489_p9 }
 0x2d4   :  { %497 = shalt.err (!%p494_p11)
}
 0x2d5   :  { %315 = dma.vmem_to_hbm [thread:$0]  %s310_s13, 256, %s655_s7, [#allocation5], %s508_s4, %s508_s4, %s509_s24  }
 0x2d6   :  { %504 = dma.done.wait [#allocation5], 256  }
 0x2d7   :  { %505 = vsyncadd [#allocation5], 4294967040 }
 0x2d8   :  { %319 = vsyncpa [#allocation4], 1 }
 0x2d9   :  { %320 = vsyncpa [#allocation7], 1 }
 0x2da   :  { %321 = vsyncpa [#allocation10], 1 }
 0x2db   :  { %322 = vsyncpa [#allocation5], 1 }

</bundles_post_ra>
